<compile_context>
chip_gen: v7x
topology: tpu7x:2x2x1
jax: 0.10.0
libtpu: 0.0.40
codegen_flags: <defaults>
</compile_context>

<pallas_src>
import functools

import jax
import jax.numpy as jnp
from jax.experimental import pallas as pl
from jax.experimental.pallas import tpu as pltpu

# Matches the PyTorch module. Note: 1e-12 < f32 machine epsilon, so the upper
# clamp bound rounds to 1.0 in f32 -- identical to the f32 PyTorch reference.
EPS = 1e-12
LANES = 128
SUBLANES = 8
TARGET_TILE_ROWS = 4096   # 4096 * 128 * 4 B = 2 MiB per input per block
NUM_SHARDS = 2            # parallel outer grid axis (both TCs on v7x)
VMEM_LIMIT_BYTES = 32 * 1024 * 1024


def _bce_kernel(n_blocks, blocks_per_shard, has_phantom,
                p_ref, t_ref, out_ref):
    i = pl.program_id(1)   # sequential tile (reduction) axis

    @pl.when(i == 0)
    def _():
        out_ref[...] = jnp.zeros_like(out_ref)

    def accumulate():
        p = p_ref[...].astype(jnp.float32)
        t = t_ref[...].astype(jnp.float32)
        p = jnp.clip(p, EPS, 1.0 - EPS)
        loss = -t * jnp.log(p) - (1.0 - t) * jnp.log(1.0 - p)
        tile_rows = loss.shape[0]
        # VALU-only partial reduce into a vreg-shaped (8, 128) accumulator; the
        # reshape splits the leading (sublane) dim so it is layout-free. The
        # single cross-lane/sublane reduce happens once, in the wrapper.
        partial = loss.reshape(tile_rows // SUBLANES, SUBLANES, LANES).sum(axis=0)
        out_ref[...] += partial[None]

    if has_phantom:
        # Block count does not divide evenly across shards: the trailing
        # "phantom" tiles re-read the (clamped) last real block; skip them so
        # nothing is double counted.
        s = pl.program_id(0)
        tile_idx = s * blocks_per_shard + i

        @pl.when(tile_idx < n_blocks)
        def _():
            accumulate()
    else:
        accumulate()


def _loss_sum_jnp(p, t):
    """Fused XLA loss-sum for tails / shapes the kernel cannot view for free."""
    p = jnp.clip(p.astype(jnp.float32), EPS, 1.0 - EPS)
    t = t.astype(jnp.float32)
    return jnp.sum(-t * jnp.log(p) - (1.0 - t) * jnp.log(1.0 - p))


def my_cross_entropy(preds: jax.Array, targets: jax.Array,
                     *, target_tile_rows: int = TARGET_TILE_ROWS) -> jax.Array:
    """Mean binary cross entropy, matching MyCrossEntropy.forward."""
    assert preds.shape == targets.shape
    total = preds.size
    rows = total // LANES

    p_flat = preds.reshape(-1)
    t_flat = targets.reshape(-1)

    if total % LANES != 0 or rows < SUBLANES:
        # A free (rows, 128) reshape is impossible (or the tensor is tiny);
        # padding would re-copy both inputs through HBM, so use the fused XLA
        # elementwise+reduce, which is already roofline-bound at this size.
        return _loss_sum_jnp(p_flat, t_flat) / jnp.float32(total)

    # Tile sizing: multiple of 8 sublanes, capped at 2 MiB/input/block.
    target_tile_rows = max(SUBLANES, (target_tile_rows // SUBLANES) * SUBLANES)
    tile_rows = min(target_tile_rows, (rows // SUBLANES) * SUBLANES)
    n_blocks = rows // tile_rows
    kernel_rows = n_blocks * tile_rows
    kernel_elems = kernel_rows * LANES

    shards = min(NUM_SHARDS, n_blocks)
    blocks_per_shard = pl.cdiv(n_blocks, shards)
    has_phantom = shards * blocks_per_shard != n_blocks

    # Free (bitcast) reshape of the original HBM buffers -- no copy, no pad.
    p2d = p_flat.reshape(rows, LANES)
    t2d = t_flat.reshape(rows, LANES)

    def in_index(s, i):
        idx = s * blocks_per_shard + i
        if has_phantom:
            idx = jnp.minimum(idx, n_blocks - 1)   # keep phantom DMAs in bounds
        return (idx, 0)

    partials = pl.pallas_call(
        functools.partial(_bce_kernel, n_blocks, blocks_per_shard, has_phantom),
        out_shape=jax.ShapeDtypeStruct((shards, SUBLANES, LANES), jnp.float32),
        grid_spec=pltpu.PrefetchScalarGridSpec(
            num_scalar_prefetch=0,
            grid=(shards, blocks_per_shard),
            in_specs=[
                pl.BlockSpec((tile_rows, LANES), in_index),
                pl.BlockSpec((tile_rows, LANES), in_index),
            ],
            out_specs=pl.BlockSpec((1, SUBLANES, LANES),
                                   lambda s, i: (s, 0, 0)),
        ),
        compiler_params=pltpu.CompilerParams(
            dimension_semantics=("parallel", "arbitrary"),
            vmem_limit_bytes=VMEM_LIMIT_BYTES,
        ),
    )(p2d, t2d)

    # Single cross-lane reduce of the tiny (shards, 8, 128) partial-sum slab.
    loss_sum = jnp.sum(partials)

    # Rows past the last full tile (< tile_rows rows): cheap suffix slice, no
    # full-array traffic.
    if kernel_elems < total:
        loss_sum = loss_sum + _loss_sum_jnp(p_flat[kernel_elems:],
                                            t_flat[kernel_elems:])
    return loss_sum / jnp.float32(total)


def _reference(preds, targets):
    p = jnp.clip(preds.astype(jnp.float32), EPS, 1.0 - EPS)
    t = targets.astype(jnp.float32)
    return jnp.mean(-t * jnp.log(p) - (1.0 - t) * jnp.log(1.0 - p))


if __name__ == "__main__":
    key = jax.random.PRNGKey(0)
    k1, k2, k3, k4, k5, k6 = jax.random.split(key, 6)

    # preds are probabilities in (0, 1); targets are binary labels.
    preds = jax.random.uniform(k1, (2, 4, 16, 16), dtype=jnp.float32)
    targets = (jax.random.uniform(k2, (2, 4, 16, 16)) > 0.5).astype(jnp.float32)

    loss = my_cross_entropy(preds, targets)
    jax.block_until_ready(loss)
    ref = _reference(preds, targets)
    assert jnp.allclose(loss, ref, rtol=1e-5, atol=1e-6), (loss, ref)

    # bf16 targets (exact for 0/1 labels) -- kernel upcasts in-body.
    loss_bf16 = my_cross_entropy(preds, targets.astype(jnp.bfloat16))
    jax.block_until_ready(loss_bf16)
    assert jnp.allclose(loss_bf16, ref, rtol=1e-5, atol=1e-6), (loss_bf16, ref)

    # Multi-shard grid + wrapper-handled tail: 2560 elems = 20 lane-rows,
    # tile_rows=8 -> 2 kernel tiles (one per shard) + 4 tail rows in jnp.
    preds2 = jax.random.uniform(k3, (2, 4, 16, 20), dtype=jnp.float32)
    targets2 = (jax.random.uniform(k4, (2, 4, 16, 20)) > 0.5).astype(jnp.float32)
    loss2 = my_cross_entropy(preds2, targets2, target_tile_rows=8)
    jax.block_until_ready(loss2)
    ref2 = _reference(preds2, targets2)
    assert jnp.allclose(loss2, ref2, rtol=1e-5, atol=1e-6), (loss2, ref2)

    # Phantom-tile path: 24 lane-rows, tile_rows=8 -> 3 blocks over 2 shards.
    preds3 = jax.random.uniform(k5, (2, 4, 16, 24), dtype=jnp.float32)
    targets3 = (jax.random.uniform(k6, (2, 4, 16, 24)) > 0.5).astype(jnp.float32)
    loss3 = my_cross_entropy(preds3, targets3, target_tile_rows=8)
    jax.block_until_ready(loss3)
    ref3 = _reference(preds3, targets3)
    assert jnp.allclose(loss3, ref3, rtol=1e-5, atol=1e-6), (loss3, ref3)

    # Non-lane-divisible shape: fused-XLA fallback path (no pad copy).
    preds4 = jax.random.uniform(k1, (2, 3, 7, 5), dtype=jnp.float32)
    targets4 = (jax.random.uniform(k2, (2, 3, 7, 5)) > 0.5).astype(jnp.float32)
    loss4 = my_cross_entropy(preds4, targets4)
    jax.block_until_ready(loss4)
    ref4 = _reference(preds4, targets4)
    assert jnp.allclose(loss4, ref4, rtol=1e-5, atol=1e-6), (loss4, ref4)

    print("KERNEL_OK")
</pallas_src>

<mosaic_0001>
module attributes {stable_mosaic.version = 11 : i64} {
  func.func @_bce_kernel(%arg0: i32, %arg1: i32, %arg2: memref<16x128xf32, #tpu.memory_space<vmem>>, %arg3: memref<16x128xf32, #tpu.memory_space<vmem>>, %arg4: memref<1x8x128xf32, #tpu.memory_space<vmem>>) attributes {dimension_semantics = [#tpu.dimension_semantics<parallel>, #tpu.dimension_semantics<arbitrary>], iteration_bounds = array<i64: 1, 1>, scalar_prefetch = 0 : i64, scratch_operands = 0 : i64, tpu.core_type = #tpu.core_type<tc>, window_params = [{transform_indices = @transform_0, window_bounds = array<i64: 16, 128>}, {transform_indices = @transform_1, window_bounds = array<i64: 16, 128>}, {transform_indices = @transform_2, window_bounds = array<i64: 1, 8, 128>}]} {
    %c0_i32 = arith.constant 0 : i32
    %0 = arith.cmpi eq, %arg1, %c0_i32 : i32
    %1 = arith.extui %0 : i1 to i32
    %c0_i32_0 = arith.constant 0 : i32
    %2 = arith.cmpi ne, %1, %c0_i32_0 : i32
    scf.if %2 {
      %cst_15 = arith.constant 0.000000e+00 : f32
      %26 = vector.broadcast %cst_15 : f32 to vector<1x8x128xf32>
      %c0_16 = arith.constant 0 : index
      %c0_17 = arith.constant 0 : index
      %c0_18 = arith.constant 0 : index
      %27 = vector.load %arg4[%c0_16, %c0_17, %c0_18] : memref<1x8x128xf32, #tpu.memory_space<vmem>>, vector<1x8x128xf32>
      tpu.vector_store %arg4[%c0_16, %c0_17, %c0_18], %26 {strides = array<i32>} : memref<1x8x128xf32, #tpu.memory_space<vmem>>, vector<1x8x128xf32>,
    } else {
    }
    %c0 = arith.constant 0 : index
    %c0_1 = arith.constant 0 : index
    %3 = vector.load %arg2[%c0, %c0_1] : memref<16x128xf32, #tpu.memory_space<vmem>>, vector<16x128xf32>
    %c0_2 = arith.constant 0 : index
    %c0_3 = arith.constant 0 : index
    %4 = vector.load %arg3[%c0_2, %c0_3] : memref<16x128xf32, #tpu.memory_space<vmem>>, vector<16x128xf32>
    %cst = arith.constant 9.99999996E-13 : f32
    %cst_4 = arith.constant 1.000000e+00 : f32
    %5 = vector.broadcast %cst : f32 to vector<16x128xf32>
    %6 = arith.maximumf %5, %3 : vector<16x128xf32>
    %7 = vector.broadcast %cst_4 : f32 to vector<16x128xf32>
    %8 = arith.minimumf %7, %6 : vector<16x128xf32>
    %cst_5 = arith.constant 0.000000e+00 : f32
    %9 = vector.broadcast %cst_5 : f32 to vector<16x128xf32>
    %10 = arith.subf %9, %4 : vector<16x128xf32>
    %11 = math.log %8 : vector<16x128xf32>
    %12 = arith.mulf %10, %11 : vector<16x128xf32>
    %cst_6 = arith.constant 1.000000e+00 : f32
    %13 = vector.broadcast %cst_6 : f32 to vector<16x128xf32>
    %14 = arith.subf %13, %4 : vector<16x128xf32>
    %cst_7 = arith.constant 1.000000e+00 : f32
    %15 = vector.broadcast %cst_7 : f32 to vector<16x128xf32>
    %16 = arith.subf %15, %8 : vector<16x128xf32>
    %17 = math.log %16 : vector<16x128xf32>
    %18 = arith.mulf %14, %17 : vector<16x128xf32>
    %19 = arith.subf %12, %18 : vector<16x128xf32>
    %20 = vector.shape_cast %19 : vector<16x128xf32> to vector<2x8x128xf32>
    %cst_8 = arith.constant dense<0.000000e+00> : vector<8x128xf32>
    %21 = vector.multi_reduction <add>, %20, %cst_8 [0] : vector<2x8x128xf32> to vector<8x128xf32>
    %c0_9 = arith.constant 0 : index
    %c0_10 = arith.constant 0 : index
    %c0_11 = arith.constant 0 : index
    %22 = vector.load %arg4[%c0_9, %c0_10, %c0_11] : memref<1x8x128xf32, #tpu.memory_space<vmem>>, vector<1x8x128xf32>
    %23 = vector.shape_cast %21 : vector<8x128xf32> to vector<1x8x128xf32>
    %24 = arith.addf %22, %23 : vector<1x8x128xf32>
    %c0_12 = arith.constant 0 : index
    %c0_13 = arith.constant 0 : index
    %c0_14 = arith.constant 0 : index
    %25 = vector.load %arg4[%c0_12, %c0_13, %c0_14] : memref<1x8x128xf32, #tpu.memory_space<vmem>>, vector<1x8x128xf32>
    tpu.vector_store %arg4[%c0_12, %c0_13, %c0_14], %24 {strides = array<i32>} : memref<1x8x128xf32, #tpu.memory_space<vmem>>, vector<1x8x128xf32>,
    return
  }
  func.func @transform_0(%arg0: i32, %arg1: i32) -> (i32, i32) {
    %c1_i32 = arith.constant 1 : i32
    %0 = arith.muli %arg0, %c1_i32 : i32
    %1 = arith.addi %0, %arg1 : i32
    %c0_i32 = arith.constant 0 : i32
    %c0_i32_0 = arith.constant 0 : i32
    return %1, %c0_i32 : i32, i32
  }
  func.func @transform_1(%arg0: i32, %arg1: i32) -> (i32, i32) {
    %c1_i32 = arith.constant 1 : i32
    %0 = arith.muli %arg0, %c1_i32 : i32
    %1 = arith.addi %0, %arg1 : i32
    %c0_i32 = arith.constant 0 : i32
    %c0_i32_0 = arith.constant 0 : i32
    return %1, %c0_i32 : i32, i32
  }
  func.func @transform_2(%arg0: i32, %arg1: i32) -> (i32, i32, i32) {
    %c0_i32 = arith.constant 0 : i32
    %c0_i32_0 = arith.constant 0 : i32
    %c0_i32_1 = arith.constant 0 : i32
    return %arg0, %c0_i32, %c0_i32_0 : i32, i32, i32
  }
}

</mosaic_0001>

<bundles_post_ra>
// kernel: tpu_custom_call.1
= control target key start
LH: loop header
LB: loop body
LE: loop exit
PB: predicated region body
PF: predicated region fallthrough
CT: control target
= control target key end

     0   :  { %7 = vsyncpa [#allocation3], 0  ;;  %s247_s0 = inlined_call_operand.hbm [shape: f32[16,128], index: 0, kind: input, shape index: {}]   ;;  %s248_s1 = inlined_call_operand.hbm [shape: f32[16,128], index: 1, kind: input, shape index: {}]   ;;  %s249_s2 = inlined_call_operand.hbm [shape: f32[1,8,128], index: 2, kind: output, shape index: {}]  }
   0x1   :  { %8 = vsyncpa [#allocation6], 0 }
   0x2   :  { %9 = vsyncpa [#allocation4], 0  ;;  %s191_s9 = smov [#allocation2]   ;;  %s119_s13 = scalar_lea.hbm %s247_s0, 256 }
   0x3   :  { %s19_s10 = sshll.u32 %s191_s9, 4  ;;  %p120_p0 = scmp.ne.s32.totalorder %s247_s0, %s119_s13  ;;  %s20_s10 = int_to_ptr.vmem [resolvable:$true] %s19_s10 }
   0x4   :  { %p123_p1 = scmp.lt.u32.totalorder %s119_s13, %s247_s0 }
   0x6   :  { %p125_p2 = pnand %p123_p1, %p120_p0 }
   0x8   :  { %128 = shalt.err (!%p125_p2)
}
   0x9   :  { %s129_s18 = scalar_lea.vmem %s20_s10, 256  ;;  %p134_p4 = scmp.lt.s32.totalorder %s20_s10, %s20_s10 }
   0xa   :  { %p130_p3 = scmp.ne.s32.totalorder %s20_s10, %s129_s18  ;;  %p135_p5 = scmp.lt.s32.totalorder %s129_s18, %s129_s18 }
   0xc   :  { %p136_p6 = por %p135_p5, %p134_p4 }
   0xe   :  { %p137_p7 = pnand %p136_p6, %p130_p3 }
  0x10   :  { %140 = shalt.err (!%p137_p7)
}
  0x11   :  { %s192_s19 = smov 128   ;;  %s193_s20 = smov 8  }
  0x12   :  { %25 = dma.hbm_to_vmem [thread:$0]  %s247_s0, 256, %s20_s10, [#allocation3], %s192_s19, %s192_s19, %s193_s20  }
  0x13   :  { %s194_s23 = smov [#allocation5]   ;;  %s141_s27 = scalar_lea.hbm %s248_s1, 256 }
  0x14   :  { %s35_s24 = sshll.u32 %s194_s23, 4  ;;  %p142_p8 = scmp.ne.s32.totalorder %s248_s1, %s141_s27  ;;  %s36_s24 = int_to_ptr.vmem [resolvable:$true] %s35_s24 }
  0x15   :  { %p145_p9 = scmp.lt.u32.totalorder %s141_s27, %s248_s1 }
  0x17   :  { %p147_p10 = pnand %p145_p9, %p142_p8 }
  0x19   :  { %150 = shalt.err (!%p147_p10)
}
  0x1a   :  { %s151_s4 = scalar_lea.vmem %s36_s24, 256  ;;  %p156_p12 = scmp.lt.s32.totalorder %s36_s24, %s36_s24 }
  0x1b   :  { %p152_p11 = scmp.ne.s32.totalorder %s36_s24, %s151_s4  ;;  %p157_p13 = scmp.lt.s32.totalorder %s151_s4, %s151_s4 }
  0x1d   :  { %p158_p0 = por %p157_p13, %p156_p12 }
  0x1f   :  { %p159_p1 = pnand %p158_p0, %p152_p11 }
  0x21   :  { %162 = shalt.err (!%p159_p1)
}
  0x22   :  { %41 = dma.hbm_to_vmem [thread:$0]  %s248_s1, 256, %s36_s24, [#allocation6], %s192_s19, %s192_s19, %s193_s20  }
  0x23   :  { %185 = dma.done.wait [#allocation3], 256  }
  0x24   :  { %186 = vsyncadd [#allocation3], 4294967040 }
  0x25   :  { %187 = dma.done.wait [#allocation6], 256  }
  0x26   :  { %188 = vsyncadd [#allocation6], 4294967040  ;;  %v57_v0 = vld [vmem:[#allocation2] sm:$0xff]  ;;  %v58_v1 = vld [vmem:[#allocation2 + $0x8] sm:$0xff]  ;;  %s195_s1 = smov [#allocation7]  }
  0x27   :  { %v61_v2 = vmax.f32 %v57_v0, 1e-12  ;;  %v62_v3 = vmax.f32 %v58_v1, 1e-12  ;;  %v59_v8 = vld [vmem:[#allocation5] sm:$0xff]  ;;  %v60_v9 = vld [vmem:[#allocation5 + $0x8] sm:$0xff] }
  0x28   :  { %v65_v10 = vsub.f32 0.0, %v59_v8  ;;  %v66_v12 = vsub.f32 0.0, %v60_v9  ;;  %v73_v15 = vsub.f32 1.0, %v59_v8  ;;  %v74_v18 = vsub.f32 1.0, %v60_v9  ;;  %s95_s6 = sshll.u32 %s195_s1, 4  ;;  %s96_s6 = int_to_ptr.vmem [resolvable:$true] %s95_s6 }
  0x29   :  { %v63_v4 = vmin.f32 %v61_v2, 1.0  ;;  %v64_v5 = vmin.f32 %v62_v3, 1.0  ;;  %s163_s7 = scalar_lea.vmem %s96_s6, 128  ;;  %p168_p3 = scmp.lt.s32.totalorder %s96_s6, %s96_s6 }
  0x2a   :  { %p164_p2 = scmp.ne.s32.totalorder %s96_s6, %s163_s7  ;;  %p169_p4 = scmp.lt.s32.totalorder %s163_s7, %s163_s7 }
  0x2b   :  { %111 = vlog2.f32 %v63_v4  ;;  %v75_v6 = vsub.f32 1.0, %v63_v4  ;;  %v76_v7 = vsub.f32 1.0, %v64_v5 }
  0x2c   :  { %113 = vlog2.f32 %v64_v5  ;;  %p170_p5 = por %p169_p4, %p168_p3 }
  0x2d   :  { %115 = vlog2.f32 %v75_v6 }
  0x2e   :  { %117 = vlog2.f32 %v76_v7  ;;  %p171_p6 = pnand %p170_p5, %p164_p2 }
  0x35   :  { %v112_v11 = vpop.eup %111 }
  0x36   :  { %v114_v13 = vpop.eup %113  ;;  %v68_v14 = vmul.f32 0.6931472, %v112_v11 }
  0x37   :  { %v116_v16 = vpop.eup %115  ;;  %v70_v17 = vmul.f32 0.6931472, %v114_v13 }
  0x38   :  { %v118_v19 = vpop.eup %117  ;;  %v71_v20 = vmul.f32 %v68_v14, %v65_v10  ;;  %v78_v21 = vmul.f32 0.6931472, %v116_v16 }
  0x39   :  { %v72_v22 = vmul.f32 %v70_v17, %v66_v12  ;;  %v80_v23 = vmul.f32 0.6931472, %v118_v19 }
  0x3a   :  { %v81_v24 = vmul.f32 %v78_v21, %v73_v15 }
  0x3b   :  { %v82_v25 = vmul.f32 %v80_v23, %v74_v18 }
  0x3c   :  { %v83_v26 = vsub.f32 %v71_v20, %v81_v24 }
  0x3d   :  { %v84_v27 = vsub.f32 %v72_v22, %v82_v25 }
  0x3f   :  { %v85_v28 = vadd.f32 %v84_v27, %v83_v26 }
  0x41   :  { %88 = vst [vmem:[#allocation7] sm:$0xff] %v85_v28 }
  0x42   :  { %174 = shalt.err (!%p171_p6)
}
  0x43   :  { %s175_s10 = scalar_lea.hbm %s249_s2, 128 }
  0x44   :  { %p176_p7 = scmp.ne.s32.totalorder %s249_s2, %s175_s10  ;;  %p179_p8 = scmp.lt.u32.totalorder %s175_s10, %s249_s2 }
  0x46   :  { %p181_p9 = pnand %p179_p8, %p176_p7 }
  0x48   :  { %184 = shalt.err (!%p181_p9)
}
  0x49   :  { %98 = dma.vmem_to_hbm [thread:$0]  %s96_s6, 128, %s249_s2, [#allocation4]  }
  0x4a   :  { %189 = dma.done.wait [#allocation4], 128  }
  0x4b   :  { %190 = vsyncadd [#allocation4], 4294967168 }
  0x4c   :  { %102 = vsyncpa [#allocation3], 1 }
  0x4d   :  { %103 = vsyncpa [#allocation6], 1 }
  0x4e   :  { %104 = vsyncpa [#allocation4], 1 }

</bundles_post_ra>
